<compile_context>
chip_gen: v7x
topology: tpu7x:2x2x1
jax: 0.10.0
libtpu: 0.0.40
codegen_flags: <defaults>
</compile_context>

<pallas_src>
import functools

import jax
import jax.numpy as jnp
from jax import lax
from jax.experimental import pallas as pl
from jax.experimental.pallas import tpu as pltpu


# --------------------------------- helpers ---------------------------------- #

def _round_up(x, m):
    return (x + m - 1) // m * m


def _pick_tile(dim, candidates):
    """Largest preferred tile that evenly divides `dim`, else the full dim."""
    for c in candidates:
        if dim % c == 0:
            return c
    return dim


# --------------------------- tiled linear kernels --------------------------- #

def _matmul_kernel(x_ref, w_ref, o_ref, acc_ref):
    """One (tm, tn) output tile accumulated over the k grid axis (no bias)."""
    @pl.when(pl.program_id(2) == 0)
    def _():
        acc_ref[...] = jnp.zeros_like(acc_ref)

    acc_ref[...] += jnp.dot(
        x_ref[...].astype(jnp.bfloat16),
        w_ref[...].astype(jnp.bfloat16),
        preferred_element_type=jnp.float32)

    @pl.when(pl.program_id(2) == pl.num_programs(2) - 1)
    def _():
        o_ref[...] = acc_ref[...].astype(o_ref.dtype)


def _matmul_bias_kernel(x_ref, w_ref, b_ref, o_ref, acc_ref):
    """Same as _matmul_kernel, adds a (1, tn) bias on the final k step."""
    @pl.when(pl.program_id(2) == 0)
    def _():
        acc_ref[...] = jnp.zeros_like(acc_ref)

    acc_ref[...] += jnp.dot(
        x_ref[...].astype(jnp.bfloat16),
        w_ref[...].astype(jnp.bfloat16),
        preferred_element_type=jnp.float32)

    @pl.when(pl.program_id(2) == pl.num_programs(2) - 1)
    def _():
        o_ref[...] = (acc_ref[...] + b_ref[...].astype(jnp.float32)).astype(o_ref.dtype)


def pallas_linear(x2d, w, b=None, out_dtype=None):
    """x2d: (M, K), w: (K, N), b: (N,) or None -> (M, N), tiled + pipelined.

    M is padded to a tileable multiple (padded rows are zero and sliced off),
    so non-divisible token counts (e.g. N=197 ViT sequences) still tile instead
    of silently becoming one giant VMEM-busting block.
    """
    M, K = x2d.shape
    K2, N = w.shape
    assert K == K2
    out_dtype = jnp.dtype(out_dtype) if out_dtype is not None else x2d.dtype

    # M tile: prefer big tiles (amortize ~0.35us/grid-step, fewer weight
    # re-reads); pad M up so the grid always divides evenly.
    if M >= 512:
        tm = 512
    elif M >= 256:
        tm = 256
    elif M >= 128:
        tm = 128
    else:
        tm = _round_up(M, 8)
    Mp = _round_up(M, tm)
    tn = _pick_tile(N, (256, 128))      # 256-multiples keep the v6e/v7x MXU full
    tk = _pick_tile(K, (512, 256, 128))

    xp = x2d if Mp == M else jnp.pad(x2d, ((0, Mp - M), (0, 0)))

    grid = (Mp // tm, N // tn, K // tk)
    in_specs = [
        pl.BlockSpec((tm, tk), lambda i, j, k: (i, k)),
        pl.BlockSpec((tk, tn), lambda i, j, k: (k, j)),
    ]
    if b is None:
        kernel = _matmul_kernel
        args = (xp, w)
        bias_bytes = 0
    else:
        kernel = _matmul_bias_kernel
        in_specs.append(pl.BlockSpec((1, tn), lambda i, j, k: (0, j)))
        args = (xp, w, b.reshape(1, N))
        bias_bytes = N * b.dtype.itemsize

    cost = pl.CostEstimate(
        flops=2 * Mp * N * K,
        transcendentals=0,
        bytes_accessed=(Mp * K * xp.dtype.itemsize
                        + K * N * w.dtype.itemsize
                        + Mp * N * out_dtype.itemsize
                        + bias_bytes))

    out = pl.pallas_call(
        kernel,
        out_shape=jax.ShapeDtypeStruct((Mp, N), out_dtype),
        grid_spec=pltpu.PrefetchScalarGridSpec(
            num_scalar_prefetch=0,
            grid=grid,
            in_specs=in_specs,
            out_specs=pl.BlockSpec((tm, tn), lambda i, j, k: (i, j)),
            scratch_shapes=[pltpu.VMEM((tm, tn), jnp.float32)],
        ),
        compiler_params=pltpu.CompilerParams(
            dimension_semantics=("parallel", "parallel", "arbitrary"),
            # Explicit budget: tiles above stay ~2 MiB double-buffered, far
            # under 32 MiB -> safe on v7x's 64 MiB VMEM as well.
            vmem_limit_bytes=32 * 1024 * 1024),
        cost_estimate=cost,
    )(*args)
    return out if Mp == M else out[:M]


# --------------------------- fused attention kernel ------------------------- #

def _attend_heads(q, k, v, heads, head_dim, out_dtype):
    """Attention for `heads` heads packed on the lane axis of q/k/v (N, heads*hd).

    The softmax scale is already folded into q (via the qkv weights).  Softmax
    math is kept in f32 (v5e-safe); the normalization is applied after the PV
    matmul on the (N, hd) result, and the store is one lane-dense slab.
    """
    outs = []
    for h in range(heads):
        lo = h * head_dim
        qh = q[:, lo:lo + head_dim]
        kh = k[:, lo:lo + head_dim]
        vh = v[:, lo:lo + head_dim]

        # q @ k^T as a contraction over the last dims (no in-kernel transpose).
        s = lax.dot_general(
            qh, kh,
            dimension_numbers=(((1,), (1,)), ((), ())),
            preferred_element_type=jnp.float32)                      # (N, N) f32

        s = s - jnp.max(s, axis=-1, keepdims=True)
        p = jnp.exp(s)                                               # f32, in (0, 1]
        denom = jnp.sum(p, axis=-1, keepdims=True)                   # (N, 1)

        o = jnp.dot(p.astype(v.dtype), vh,
                    preferred_element_type=jnp.float32)              # (N, hd) f32
        # Normalize the small (N, hd) result instead of the (N, N) prob matrix.
        o = o * pl.reciprocal(denom, approx=True)
        outs.append(o)

    out = outs[0] if heads == 1 else jnp.concatenate(outs, axis=-1)
    return out.astype(out_dtype)


def _mha_group_kernel(q_ref, k_ref, v_ref, o_ref, *, heads, head_dim):
    """One batch element x one 128-lane head group per grid step."""
    o_ref[0] = _attend_heads(q_ref[0], k_ref[0], v_ref[0], heads, head_dim,
                             o_ref.dtype)


def _mha_full_kernel(qkv_ref, o_ref, *, num_heads, head_dim, embed_dim):
    """Fallback for small embed dims: whole qkv block for one batch element."""
    qkv = qkv_ref[0]                                    # (N, 3C)
    q = qkv[:, :embed_dim]
    k = qkv[:, embed_dim:2 * embed_dim]
    v = qkv[:, 2 * embed_dim:]
    o_ref[0] = _attend_heads(q, k, v, num_heads, head_dim, o_ref.dtype)


def pallas_mha(qkv, num_heads, embed_dim):
    """qkv: (B, N, 3C) -> attention output (B, N, C) in the same dtype."""
    B, N, three_c = qkv.shape
    assert three_c == 3 * embed_dim
    head_dim = embed_dim // num_heads

    cost = pl.CostEstimate(
        flops=4 * B * num_heads * N * N * head_dim,
        transcendentals=B * num_heads * N * N,
        bytes_accessed=(B * N * (3 * embed_dim + embed_dim)) * qkv.dtype.itemsize)

    # Lane width of one head group: must contain whole heads, be a multiple of
    # 128 (BlockSpec last-dim rule on the 3C lane axis), and divide embed_dim.
    if head_dim <= 128 and 128 % head_dim == 0:
        lane_group = 128
    elif head_dim % 128 == 0:
        lane_group = head_dim
    else:
        lane_group = 0

    if lane_group and embed_dim % lane_group == 0:
        n_groups = embed_dim // lane_group
        heads_per_group = lane_group // head_dim
        kernel = functools.partial(
            _mha_group_kernel, heads=heads_per_group, head_dim=head_dim)
        blk = (1, N, lane_group)
        return pl.pallas_call(
            kernel,
            out_shape=jax.ShapeDtypeStruct((B, N, embed_dim), qkv.dtype),
            grid_spec=pltpu.PrefetchScalarGridSpec(
                num_scalar_prefetch=0,
                grid=(B, n_groups),
                # qkv passed three times; q/k/v selected purely by lane-block
                # index_maps -> no 5-D reshape/transpose round trip in HBM.
                in_specs=[
                    pl.BlockSpec(blk, lambda b, g: (b, 0, g)),
                    pl.BlockSpec(blk, lambda b, g: (b, 0, n_groups + g)),
                    pl.BlockSpec(blk, lambda b, g: (b, 0, 2 * n_groups + g)),
                ],
                out_specs=pl.BlockSpec(blk, lambda b, g: (b, 0, g)),
            ),
            compiler_params=pltpu.CompilerParams(
                dimension_semantics=("parallel", "parallel"),
                vmem_limit_bytes=32 * 1024 * 1024),
            cost_estimate=cost,
        )(qkv, qkv, qkv)

    # Fallback (small embed dims, e.g. the tiny test config): one batch element
    # per grid step, full (1, N, 3C) block, heads unrolled inside.
    kernel = functools.partial(
        _mha_full_kernel, num_heads=num_heads, head_dim=head_dim,
        embed_dim=embed_dim)
    return pl.pallas_call(
        kernel,
        out_shape=jax.ShapeDtypeStruct((B, N, embed_dim), qkv.dtype),
        grid_spec=pltpu.PrefetchScalarGridSpec(
            num_scalar_prefetch=0,
            grid=(B,),
            in_specs=[pl.BlockSpec((1, N, three_c), lambda b: (b, 0, 0))],
            out_specs=pl.BlockSpec((1, N, embed_dim), lambda b: (b, 0, 0)),
        ),
        compiler_params=pltpu.CompilerParams(
            dimension_semantics=("parallel",),
            vmem_limit_bytes=32 * 1024 * 1024),
        cost_estimate=cost,
    )(qkv)


# -------------------------------- forward ----------------------------------- #

def attention_forward(x, prepared_params, num_heads):
    """Equivalent of Attention.forward for x of shape (B, N, C).

    `prepared_params` must come from prepare_params (bf16 weights, softmax
    scale folded into the q columns of w_qkv).
    """
    B, N, C = x.shape

    # Fused qkv projection. qkv_bias=False -> bias-free kernel. Output bf16.
    qkv = pallas_linear(x.reshape(B * N, C), prepared_params["w_qkv"],
                        out_dtype=jnp.bfloat16)                     # (B*N, 3C)
    qkv = qkv.reshape(B, N, 3 * C)                                  # free reshape

    # Fused multi-head attention; output already in (B, N, C) layout, bf16.
    # (attn dropout p=0.0 -> identity)
    out = pallas_mha(qkv, num_heads, C)                             # (B, N, C)

    # Output projection (+bias) back to the input dtype.
    # (proj dropout p=0.0 -> identity)
    out = pallas_linear(out.reshape(B * N, C), prepared_params["w_proj"],
                        prepared_params["b_proj"], out_dtype=x.dtype)
    return out.reshape(B, N, C)


def init_params(key, embed_dim):
    """Torch-equivalent f32 parameters; weights stored as (in, out)."""
    k1, k2, k3 = jax.random.split(key, 3)
    scale = 1.0 / jnp.sqrt(jnp.float32(embed_dim))
    return {
        "w_qkv": jax.random.normal(k1, (embed_dim, 3 * embed_dim), jnp.float32) * scale,
        "w_proj": jax.random.normal(k2, (embed_dim, embed_dim), jnp.float32) * scale,
        "b_proj": jax.random.normal(k3, (embed_dim,), jnp.float32) * 0.01,
    }


def prepare_params(params, num_heads):
    """One-time host-side prep: fold head_dim**-0.5 into the q columns of w_qkv
    and cast the weight matrices to bf16 (halves weight-tile HBM traffic)."""
    embed_dim = params["w_proj"].shape[0]
    head_dim = embed_dim // num_heads
    scale = jnp.float32(head_dim) ** -0.5
    w_qkv = params["w_qkv"].at[:, :embed_dim].multiply(scale)
    return {
        "w_qkv": w_qkv.astype(jnp.bfloat16),
        "w_proj": params["w_proj"].astype(jnp.bfloat16),
        "b_proj": params["b_proj"].astype(jnp.float32),
    }


# ------------------------------- reference ---------------------------------- #

def attention_reference(x, params, num_heads):
    B, N, C = x.shape
    hd = C // num_heads
    qkv = x @ params["w_qkv"]                       # qkv_bias=False
    qkv = qkv.reshape(B, N, 3, num_heads, hd).transpose(2, 0, 3, 1, 4)
    q, k, v = qkv[0], qkv[1], qkv[2]
    s = jnp.einsum("bhqd,bhkd->bhqk", q, k) * (hd ** -0.5)
    p = jax.nn.softmax(s, axis=-1)
    o = jnp.einsum("bhqk,bhkd->bhqd", p, v)
    o = o.transpose(0, 2, 1, 3).reshape(B, N, C)
    return o @ params["w_proj"] + params["b_proj"]


if __name__ == "__main__":
    key = jax.random.PRNGKey(0)
    k1, k2, k3, k4 = jax.random.split(key, 4)

    def run_case(B, N, C, H, kx, kp):
        x = jax.random.normal(kx, (B, N, C), jnp.float32)
        params = init_params(kp, C)
        out = attention_forward(x, prepare_params(params, H), H)
        out = jax.block_until_ready(out)
        ref = attention_reference(x, params, H)
        assert out.shape == (B, N, C)
        err = float(jnp.max(jnp.abs(out - ref)))
        # bf16 weights/activations (f32 accumulation) vs. an all-f32 reference.
        assert jnp.allclose(out, ref, atol=5e-2, rtol=5e-2), err

    # Small config (exercises the fallback full-qkv-block attention path).
    run_case(2, 8, 32, 4, k1, k2)
    # head_dim=64 config (exercises the 128-lane head-group grid path).
    run_case(2, 16, 256, 4, k3, k4)

    print("KERNEL_OK")
</pallas_src>

<mosaic_0001>
module attributes {stable_mosaic.version = 11 : i64} {
  func.func @_matmul_kernel(%arg0: i32, %arg1: i32, %arg2: i32, %arg3: memref<16x32xf32, #tpu.memory_space<vmem>>, %arg4: memref<32x96xbf16, #tpu.memory_space<vmem>>, %arg5: memref<16x96xbf16, #tpu.memory_space<vmem>>, %arg6: memref<16x96xf32, #tpu.memory_space<vmem>>) attributes {dimension_semantics = [#tpu.dimension_semantics<parallel>, #tpu.dimension_semantics<parallel>, #tpu.dimension_semantics<arbitrary>], iteration_bounds = array<i64: 1, 1, 1>, scalar_prefetch = 0 : i64, scratch_operands = 1 : i64, tpu.core_type = #tpu.core_type<tc>, window_params = [{transform_indices = @transform_0, window_bounds = array<i64: 16, 32>}, {transform_indices = @transform_1, window_bounds = array<i64: 32, 96>}, {transform_indices = @transform_2, window_bounds = array<i64: 16, 96>}]} {
    %c0_i32 = arith.constant 0 : i32
    %0 = arith.cmpi eq, %arg2, %c0_i32 : i32
    %1 = arith.extui %0 : i1 to i32
    %c0_i32_0 = arith.constant 0 : i32
    %2 = arith.cmpi ne, %1, %c0_i32_0 : i32
    scf.if %2 {
      %cst_10 = arith.constant 0.000000e+00 : f32
      %13 = vector.broadcast %cst_10 : f32 to vector<16x96xf32>
      %c0_11 = arith.constant 0 : index
      %c0_12 = arith.constant 0 : index
      %14 = vector.load %arg6[%c0_11, %c0_12] : memref<16x96xf32, #tpu.memory_space<vmem>>, vector<16x96xf32>
      tpu.vector_store %arg6[%c0_11, %c0_12], %13 {strides = array<i32>} : memref<16x96xf32, #tpu.memory_space<vmem>>, vector<16x96xf32>,
    } else {
    }
    %c0 = arith.constant 0 : index
    %c0_1 = arith.constant 0 : index
    %3 = vector.load %arg6[%c0, %c0_1] : memref<16x96xf32, #tpu.memory_space<vmem>>, vector<16x96xf32>
    %c0_2 = arith.constant 0 : index
    %c0_3 = arith.constant 0 : index
    %4 = vector.load %arg3[%c0_2, %c0_3] : memref<16x32xf32, #tpu.memory_space<vmem>>, vector<16x32xf32>
    %5 = arith.truncf %4 : vector<16x32xf32> to vector<16x32xbf16>
    %c0_4 = arith.constant 0 : index
    %c0_5 = arith.constant 0 : index
    %6 = vector.load %arg4[%c0_4, %c0_5] : memref<32x96xbf16, #tpu.memory_space<vmem>>, vector<32x96xbf16>
    %cst = arith.constant dense<0.000000e+00> : vector<16x96xf32>
    %7 = tpu.matmul %5, %6, %cst {dimension_numbers = #tpu.dot_dimension_numbers<[1], [0], [0], [1], [0, 0, 1, 1], [], []>} : vector<16x32xbf16>, vector<32x96xbf16>, vector<16x96xf32> -> vector<16x96xf32>
    %8 = arith.addf %3, %7 : vector<16x96xf32>
    %c0_6 = arith.constant 0 : index
    %c0_7 = arith.constant 0 : index
    %9 = vector.load %arg6[%c0_6, %c0_7] : memref<16x96xf32, #tpu.memory_space<vmem>>, vector<16x96xf32>
    tpu.vector_store %arg6[%c0_6, %c0_7], %8 {strides = array<i32>} : memref<16x96xf32, #tpu.memory_space<vmem>>, vector<16x96xf32>,
    %c0_i32_8 = arith.constant 0 : i32
    %10 = arith.cmpi eq, %arg2, %c0_i32_8 : i32
    %11 = arith.extui %10 : i1 to i32
    %c0_i32_9 = arith.constant 0 : i32
    %12 = arith.cmpi ne, %11, %c0_i32_9 : i32
    scf.if %12 {
      %c0_10 = arith.constant 0 : index
      %c0_11 = arith.constant 0 : index
      %13 = vector.load %arg6[%c0_10, %c0_11] : memref<16x96xf32, #tpu.memory_space<vmem>>, vector<16x96xf32>
      %14 = arith.truncf %13 : vector<16x96xf32> to vector<16x96xbf16>
      %c0_12 = arith.constant 0 : index
      %c0_13 = arith.constant 0 : index
      %15 = vector.load %arg5[%c0_12, %c0_13] : memref<16x96xbf16, #tpu.memory_space<vmem>>, vector<16x96xbf16>
      tpu.vector_store %arg5[%c0_12, %c0_13], %14 {strides = array<i32>} : memref<16x96xbf16, #tpu.memory_space<vmem>>, vector<16x96xbf16>,
    } else {
    }
    return
  }
  func.func @transform_0(%arg0: i32, %arg1: i32, %arg2: i32) -> (i32, i32) {
    %c0_i32 = arith.constant 0 : i32
    return %arg0, %arg2 : i32, i32
  }
  func.func @transform_1(%arg0: i32, %arg1: i32, %arg2: i32) -> (i32, i32) {
    %c0_i32 = arith.constant 0 : i32
    return %arg2, %arg1 : i32, i32
  }
  func.func @transform_2(%arg0: i32, %arg1: i32, %arg2: i32) -> (i32, i32) {
    %c0_i32 = arith.constant 0 : i32
    return %arg0, %arg1 : i32, i32
  }
}

</mosaic_0001>

<bundles_post_ra>
// kernel: tpu_custom_call.1
= control target key start
LH: loop header
LB: loop body
LE: loop exit
PB: predicated region body
PF: predicated region fallthrough
CT: control target
= control target key end

     0   :  { %7 = vsyncpa [#allocation4], 0  ;;  %s324_s0 = inlined_call_operand.hbm [shape: f32[16,32], index: 0, kind: input, shape index: {}]   ;;  %s325_s1 = inlined_call_operand.hbm [shape: bf16[32,96], index: 1, kind: input, shape index: {}]   ;;  %s326_s2 = inlined_call_operand.hbm [shape: bf16[16,96], index: 2, kind: output, shape index: {}]  }
   0x1   :  { %8 = vsyncpa [#allocation7], 0 }
   0x2   :  { %9 = vsyncpa [#allocation5], 0  ;;  %s254_s9 = smov [#allocation3]   ;;  %s182_s13 = scalar_lea.hbm %s324_s0, 256 }
   0x3   :  { %s15_s10 = sshll.u32 %s254_s9, 4  ;;  %p183_p0 = scmp.ne.s32.totalorder %s324_s0, %s182_s13  ;;  %s16_s10 = int_to_ptr.vmem [resolvable:$true] %s15_s10 }
   0x4   :  { %p186_p1 = scmp.lt.u32.totalorder %s182_s13, %s324_s0 }
   0x6   :  { %p188_p2 = pnand %p186_p1, %p183_p0 }
   0x8   :  { %191 = shalt.err (!%p188_p2)
}
   0x9   :  { %s192_s18 = scalar_lea.vmem %s16_s10, 256  ;;  %p197_p4 = scmp.lt.s32.totalorder %s16_s10, %s16_s10 }
   0xa   :  { %p193_p3 = scmp.ne.s32.totalorder %s16_s10, %s192_s18  ;;  %p198_p5 = scmp.lt.s32.totalorder %s192_s18, %s192_s18 }
   0xc   :  { %p199_p6 = por %p198_p5, %p197_p4 }
   0xe   :  { %p200_p7 = pnand %p199_p6, %p193_p3 }
  0x10   :  { %203 = shalt.err (!%p200_p7)
}
  0x11   :  { %s255_s19 = smov 128   ;;  %s256_s20 = smov 8  }
  0x12   :  { %21 = dma.hbm_to_vmem [thread:$0]  %s324_s0, 256, %s16_s10, [#allocation4], %s255_s19, %s255_s19, %s256_s20  }
  0x13   :  { %s257_s23 = smov [#allocation6]   ;;  %s204_s27 = scalar_lea.hbm %s325_s1, 256 }
  0x14   :  { %s27_s24 = sshll.u32 %s257_s23, 4  ;;  %p205_p8 = scmp.ne.s32.totalorder %s325_s1, %s204_s27  ;;  %s28_s24 = int_to_ptr.vmem [resolvable:$true] %s27_s24 }
  0x15   :  { %p208_p9 = scmp.lt.u32.totalorder %s204_s27, %s325_s1 }
  0x17   :  { %p210_p10 = pnand %p208_p9, %p205_p8 }
  0x19   :  { %213 = shalt.err (!%p210_p10)
}
  0x1a   :  { %s214_s4 = scalar_lea.vmem %s28_s24, 256  ;;  %p219_p12 = scmp.lt.s32.totalorder %s28_s24, %s28_s24 }
  0x1b   :  { %p215_p11 = scmp.ne.s32.totalorder %s28_s24, %s214_s4  ;;  %p220_p13 = scmp.lt.s32.totalorder %s214_s4, %s214_s4 }
  0x1d   :  { %p221_p0 = por %p220_p13, %p219_p12 }
  0x1f   :  { %p222_p1 = pnand %p221_p0, %p215_p11 }
  0x21   :  { %225 = shalt.err (!%p222_p1)
}
  0x22   :  { %s258_s0 = smov 64   ;;  %s259_s5 = smov 4  }
  0x23   :  { %33 = dma.hbm_to_vmem [thread:$0]  %s325_s1, 256, %s28_s24, [#allocation7], %s258_s0, %s258_s0, %s259_s5  }
  0x24   :  { %248 = dma.done.wait [#allocation4], 256  }
  0x25   :  { %249 = vsyncadd [#allocation4], 4294967040 }
  0x26   :  { %250 = dma.done.wait [#allocation7], 256  }
  0x27   :  { %251 = vsyncadd [#allocation7], 4294967040  ;;  %vm45_vm0 = vcmask 785408   ;;  %v260_v0 = vmov 0.0   ;;  %vm261_vm1 = vmmov 0   ;;  %v180_v1 = vld [vmem:[#allocation6] sm:$0xff]  }
  0x28   :  { %46 = vst.msk [vmem:[#allocation2] sm:$0xff] %vm45_vm0, %v260_v0  ;;  %47 = vst.msk [vmem:[#allocation2 + $0x8] sm:$0xff] %vm45_vm0, %v260_v0  ;;  %163 = vmatprep.subr.bf16.mxu0 %v260_v0  ;;  %167 = vmatprep.mubr.msk.bf16.mxu0 %vm261_vm1, %v260_v0  ;;  %v181_v2 = vld [vmem:[#allocation6 + $0x8] sm:$0xff]   ;;  %v50_v3 = vld [vmem:[#allocation3] sm:$0xff]  ;;  %vm69_vm2 = vcmask 261120   ;;  %vm132_vm3 = vcmask 781312  }
  0x29   :  { %164 = vmatpush3.bf16.msra.mxu0 %v180_v1  ;;  %v51_v4 = vld [vmem:[#allocation3 + $0x8] sm:$0xff]  ;;  %s262_s1 = smov [#allocation8]  }
  0x2a   :  { %165 = vmatprep.subr.bf16.mxu0 %v260_v0  ;;  %v52_v5 = vpack.c.bf16 %v51_v4, %v50_v3  ;;  %s140_s8 = sshll.u32 %s262_s1, 4  ;;  %s141_s8 = int_to_ptr.vmem [resolvable:$true] %s140_s8 }
  0x2b   :  { %s226_s9 = scalar_lea.vmem %s141_s8, 128  ;;  %p231_p3 = scmp.lt.s32.totalorder %s141_s8, %s141_s8 }
  0x2c   :  { %p227_p2 = scmp.ne.s32.totalorder %s141_s8, %s226_s9  ;;  %p232_p4 = scmp.lt.s32.totalorder %s226_s9, %s226_s9 }
  0x2d   :  { %166 = vmatpush3.bf16.msra.mxu0 %v181_v2 }
  0x2e   :  { %p233_p5 = por %p232_p4, %p231_p3 }
  0x2f   :  { %v48_v6 = vld [vmem:[#allocation2] sm:$0xff]  ;;  %v49_v8 = vld [vmem:[#allocation2 + $0x8] sm:$0xff] }
  0x30   :  { %168 = vmatmul.mubr.msk.bf16.vlgmr.msra.gmra.mrb[0].mxu0 %vm69_vm2, %v52_v5  ;;  %p234_p6 = pnand %p233_p5, %p227_p2 }
 0x103   :  { %v107_v7 = vpop.f32.mrb[0].mxu0 }
 0x104   :  { %v114_v9 = vadd.f32 %v107_v7, %v48_v6  ;;  %v169_v10 = vpop.f32.mrb[1].mxu0 }
 0x105   :  { %v110_v11 = vpop.f32.mrb[2].mxu0 }
 0x106   :  { %117 = vst.msk [vmem:[#allocation2] sm:$0xff] %vm45_vm0, %v114_v9  ;;  %v115_v12 = vadd.f32 %v110_v11, %v49_v8  ;;  %v170_v13 = vpop.f32.mrb[3].mxu0 }
 0x108   :  { %118 = vst.msk [vmem:[#allocation2 + $0x8] sm:$0xff] %vm45_vm0, %v115_v12 }
 0x10d   :  { %v122_v14 = vld [vmem:[#allocation2] sm:$0xff] }
 0x10e   :  { %v158_v15 = vpack.c.bf16 %v122_v14, %v122_v14 }
 0x10f   :  { %v123_v16 = vld [vmem:[#allocation2 + $0x8] sm:$0xff] }
 0x110   :  { %v159_v17 = vpack.c.bf16 %v123_v16, %v123_v16  ;;  %133 = vst.msk [vmem:[#allocation8] sm:$0xf] %vm132_vm3, %v158_v15 }
 0x112   :  { %134 = vst.msk [vmem:[#allocation8 + $0x4] sm:$0xf] %vm132_vm3, %v159_v17 }
 0x113   :  { %237 = shalt.err (!%p234_p6)
}
 0x114   :  { %s238_s12 = scalar_lea.hbm %s326_s2, 128 }
 0x115   :  { %p239_p7 = scmp.ne.s32.totalorder %s326_s2, %s238_s12  ;;  %p242_p8 = scmp.lt.u32.totalorder %s238_s12, %s326_s2 }
 0x117   :  { %p244_p9 = pnand %p242_p8, %p239_p7 }
 0x119   :  { %247 = shalt.err (!%p244_p9)
}
 0x11a   :  { %146 = dma.vmem_to_hbm [thread:$0]  %s141_s8, 128, %s326_s2, [#allocation5], %s258_s0, %s258_s0, %s259_s5  }
 0x11b   :  { %252 = dma.done.wait [#allocation5], 128  }
 0x11c   :  { %253 = vsyncadd [#allocation5], 4294967168 }
 0x11d   :  { %150 = vsyncpa [#allocation4], 1 }
 0x11e   :  { %151 = vsyncpa [#allocation7], 1 }
 0x11f   :  { %152 = vsyncpa [#allocation5], 1 }

</bundles_post_ra>
